<compile_context>
chip_gen: v7x
topology: tpu7x:2x2x1
jax: 0.10.0
libtpu: 0.0.40
codegen_flags: <defaults>
</compile_context>

<pallas_src>
import functools
import math

import numpy as np
import jax
import jax.numpy as jnp
from jax.experimental import pallas as pl
from jax.experimental.pallas import tpu as pltpu

_LANE = 128
_SUB = 8
_VMEM_LIMIT = 48 * 1024 * 1024          # < v7x 64 MiB physical, > 32 MiB scoped default
_FUSE_BUDGET = 12 * 1024 * 1024         # VMEM budget for the fused early-layer prefix
_SENT = np.int64(1) << 50               # "padded / invalid row" marker for perm tracking


def _round_up(x, m):
    return ((x + m - 1) // m) * m


def _leaky(v):
    # LeakyReLU(0.2), f32 element-wise path
    return jnp.where(v > 0, v, 0.2 * v)


def _children_per_step(degree):
    for c in (4, 2, 1):
        if degree % c == 0:
            return c
    return 1


def _pick_tm(m, bytes_per_row, target=1024, budget=16 << 20):
    """Largest multiple-of-8 row tile <= target (and VMEM budget) dividing m."""
    if m <= _SUB:
        return m
    cap = min(target, m, max(_SUB, (budget // max(bytes_per_row, 1)) // _SUB * _SUB))
    tm = (cap // _SUB) * _SUB
    while tm >= _SUB:
        if m % tm == 0:
            return tm
        tm -= _SUB
    return m   # rows are padded to a multiple of 8, so this is not reached in practice


# --------------------------------- kernels ------------------------------------

def tree_layer_kernel(x_ref, wroot_ref, w1_ref, w2_ref, bias_ref, o_ref, *, activation):
    """degree == 1:  out = x @ W_root + W2(leaky(x @ W1)) + bias  [+ leaky]."""
    mxu_dt = wroot_ref.dtype
    x = x_ref[...].astype(mxu_dt)                                             # (tm, Fin)
    root = jnp.dot(x, wroot_ref[...], preferred_element_type=jnp.float32)
    h = _leaky(jnp.dot(x, w1_ref[...], preferred_element_type=jnp.float32))
    loop = jnp.dot(h.astype(mxu_dt), w2_ref[...], preferred_element_type=jnp.float32)
    out = root + loop + bias_ref[...]
    if activation:
        out = _leaky(out)
    o_ref[...] = out.astype(o_ref.dtype)


def tree_layer_upsample_kernel(x_ref, wroot_ref, wbranch_ref, w1_ref, w2_ref,
                               bias_ref, o_ref, *, activation, cpb, fin_p):
    """degree > 1.  grid = (row_blocks, degree // cpb); step (i, j) produces
    children [j*cpb, (j+1)*cpb) of every node in row block i as lane-dense
    (tm, Fout) slabs.  One wide branch matmul per step; root + bias recomputed
    per step (negligible) so both grid axes stay 'parallel'."""
    mxu_dt = wroot_ref.dtype
    x = x_ref[...].astype(mxu_dt)                                             # (tm, Fin)
    rb = jnp.dot(x, wroot_ref[...], preferred_element_type=jnp.float32) + bias_ref[...]
    branch_all = jnp.dot(x, wbranch_ref[...], preferred_element_type=jnp.float32)  # (tm, cpb*Fin)
    for c in range(cpb):
        br = branch_all[:, c * fin_p:(c + 1) * fin_p].astype(mxu_dt)
        h = _leaky(jnp.dot(br, w1_ref[...], preferred_element_type=jnp.float32))
        loop = jnp.dot(h.astype(mxu_dt), w2_ref[...], preferred_element_type=jnp.float32)
        out = loop + rb
        if activation:
            out = _leaky(out)
        o_ref[c] = out.astype(o_ref.dtype)


def fused_prefix_kernel(*refs, metas):
    """All small early layers in one kernel; activations never leave VMEM.
    Row order between layers is child-major (undone by the final host-side gather)."""
    x_ref, o_ref = refs[0], refs[-1]
    wrefs = refs[1:-1]
    x = x_ref[...].astype(jnp.float32)
    wi = 0
    for (degree, fin_p, activation) in metas:
        wroot = wrefs[wi]; wi += 1
        wbranch = None
        if degree > 1:
            wbranch = wrefs[wi]; wi += 1
        w1, w2, bias = wrefs[wi], wrefs[wi + 1], wrefs[wi + 2]; wi += 3
        mxu_dt = wroot.dtype
        xm = x.astype(mxu_dt)
        rb = jnp.dot(xm, wroot[...], preferred_element_type=jnp.float32) + bias[...]
        if degree == 1:
            h = _leaky(jnp.dot(xm, w1[...], preferred_element_type=jnp.float32))
            out = jnp.dot(h.astype(mxu_dt), w2[...], preferred_element_type=jnp.float32) + rb
        else:
            branch_all = jnp.dot(xm, wbranch[...], preferred_element_type=jnp.float32)
            blocks = []
            for j in range(degree):
                br = branch_all[:, j * fin_p:(j + 1) * fin_p].astype(mxu_dt)
                h = _leaky(jnp.dot(br, w1[...], preferred_element_type=jnp.float32))
                blocks.append(jnp.dot(h.astype(mxu_dt), w2[...],
                                      preferred_element_type=jnp.float32) + rb)
            out = jnp.concatenate(blocks, axis=0)   # child-major rows (8-aligned)
        x = _leaky(out) if activation else out
    o_ref[...] = x.astype(o_ref.dtype)


# --------------------------- per-layer pallas_call -----------------------------

def _plain_layer(x2d, p, activation, out_dtype):
    m, fin_p = x2d.shape
    fout_p = p["fout_p"]
    hid_p = p["W1"].shape[1]
    tm = _pick_tm(m, 4 * (fin_p + hid_p + 2 * fout_p))
    kern = functools.partial(tree_layer_kernel, activation=activation)
    flops = 2 * m * (fin_p * fout_p + fin_p * hid_p + hid_p * fout_p)
    bytes_acc = (x2d.size * x2d.dtype.itemsize
                 + sum(int(p[k].size) * p[k].dtype.itemsize
                       for k in ("W_root", "W1", "W2", "bias"))
                 + m * fout_p * jnp.dtype(out_dtype).itemsize)
    return pl.pallas_call(
        kern,
        out_shape=jax.ShapeDtypeStruct((m, fout_p), out_dtype),
        grid_spec=pltpu.PrefetchScalarGridSpec(
            num_scalar_prefetch=0,
            grid=(m // tm,),
            in_specs=[
                pl.BlockSpec((tm, fin_p), lambda i: (i, 0)),        # x tile (pipelined)
                pl.BlockSpec((fin_p, fout_p), lambda i: (0, 0)),    # W_root (resident)
                pl.BlockSpec((fin_p, hid_p), lambda i: (0, 0)),     # W1
                pl.BlockSpec((hid_p, fout_p), lambda i: (0, 0)),    # W2
                pl.BlockSpec((1, fout_p), lambda i: (0, 0)),        # bias
            ],
            out_specs=pl.BlockSpec((tm, fout_p), lambda i: (i, 0)),
        ),
        compiler_params=pltpu.CompilerParams(
            dimension_semantics=("parallel",),
            vmem_limit_bytes=_VMEM_LIMIT),
        cost_estimate=pl.CostEstimate(flops=int(flops), transcendentals=0,
                                      bytes_accessed=int(bytes_acc)),
    )(x2d, p["W_root"], p["W1"], p["W2"], p["bias"])


def _upsample_layer(x2d, p, degree, activation, out_dtype):
    m, fin_p = x2d.shape
    fout_p = p["fout_p"]
    hid_p = p["W1"].shape[1]
    cpb = _children_per_step(degree)
    tm = _pick_tm(m, 4 * ((1 + cpb) * fin_p + hid_p + (1 + cpb) * fout_p))
    kern = functools.partial(tree_layer_upsample_kernel,
                             activation=activation, cpb=cpb, fin_p=fin_p)
    flops = (2 * m * degree * (fin_p * fin_p + fin_p * hid_p + hid_p * fout_p)
             + 2 * m * (degree // cpb) * fin_p * fout_p)
    bytes_acc = (x2d.size * x2d.dtype.itemsize
                 + sum(int(p[k].size) * p[k].dtype.itemsize
                       for k in ("W_root", "W_branch", "W1", "W2", "bias"))
                 + degree * m * fout_p * jnp.dtype(out_dtype).itemsize)
    out = pl.pallas_call(
        kern,
        out_shape=jax.ShapeDtypeStruct((degree, m, fout_p), out_dtype),
        grid_spec=pltpu.PrefetchScalarGridSpec(
            num_scalar_prefetch=0,
            grid=(m // tm, degree // cpb),
            in_specs=[
                pl.BlockSpec((tm, fin_p), lambda i, j: (i, 0)),            # x tile
                pl.BlockSpec((fin_p, fout_p), lambda i, j: (0, 0)),        # W_root
                pl.BlockSpec((fin_p, cpb * fin_p), lambda i, j: (0, j)),   # W_branch slab
                pl.BlockSpec((fin_p, hid_p), lambda i, j: (0, 0)),         # W1
                pl.BlockSpec((hid_p, fout_p), lambda i, j: (0, 0)),        # W2
                pl.BlockSpec((1, fout_p), lambda i, j: (0, 0)),            # bias
            ],
            out_specs=pl.BlockSpec((cpb, tm, fout_p), lambda i, j: (j, i, 0)),
        ),
        compiler_params=pltpu.CompilerParams(
            dimension_semantics=("parallel", "parallel"),   # both axes core-shardable (v7x)
            vmem_limit_bytes=_VMEM_LIMIT),
        cost_estimate=pl.CostEstimate(flops=int(flops), transcendentals=0,
                                      bytes_accessed=int(bytes_acc)),
    )(x2d, p["W_root"], p["W_branch"], p["W1"], p["W2"], p["bias"])
    return out.reshape(degree * m, fout_p)   # child-major rows


def _fused_prefix(x2d, prepped, degrees, act_dtype):
    m0, _ = x2d.shape
    args = [x2d]
    in_specs = [pl.BlockSpec(x2d.shape, lambda i: (0, 0))]
    metas = []
    rows = m0
    flops = 0
    bytes_acc = x2d.size * x2d.dtype.itemsize
    for p, d in zip(prepped, degrees):
        fin_p, fout_p = p["fin_p"], p["fout_p"]
        hid_p = p["W1"].shape[1]
        metas.append((d, fin_p, True))   # every fused (non-final) layer keeps its LeakyReLU
        keys = ("W_root",) + (("W_branch",) if d > 1 else ()) + ("W1", "W2", "bias")
        for k in keys:
            w = p[k]
            args.append(w)
            in_specs.append(pl.BlockSpec(w.shape, lambda i: (0, 0)))
            bytes_acc += int(w.size) * w.dtype.itemsize
        flops += 2 * rows * (fin_p * fout_p + d * (fin_p * hid_p + hid_p * fout_p)
                             + (d * fin_p * fin_p if d > 1 else 0))
        rows *= d
    fout_p_last = prepped[-1]["fout_p"]
    bytes_acc += rows * fout_p_last * jnp.dtype(act_dtype).itemsize
    kern = functools.partial(fused_prefix_kernel, metas=tuple(metas))
    return pl.pallas_call(
        kern,
        out_shape=jax.ShapeDtypeStruct((rows, fout_p_last), act_dtype),
        grid_spec=pltpu.PrefetchScalarGridSpec(
            num_scalar_prefetch=0,
            grid=(1,),
            in_specs=in_specs,
            out_specs=pl.BlockSpec((rows, fout_p_last), lambda i: (0, 0)),
        ),
        compiler_params=pltpu.CompilerParams(
            dimension_semantics=("arbitrary",),
            vmem_limit_bytes=_VMEM_LIMIT),
        cost_estimate=pl.CostEstimate(flops=int(flops), transcendentals=0,
                                      bytes_accessed=int(bytes_acc)),
    )(*args)


def _fused_prefix_len(prepped, degrees, m0, budget=_FUSE_BUDGET):
    """How many leading layers to fuse into one VMEM-resident kernel."""
    n_layers = len(prepped)
    rows, weight_bytes, n_fuse = m0, 0, 0
    for i in range(n_layers - 1):          # the big final layer always uses the tiled path
        p, d = prepped[i], degrees[i]
        hid_p = p["W1"].shape[1]
        keys = ("W_root",) + (("W_branch",) if d > 1 else ()) + ("W1", "W2", "bias")
        wb = sum(int(p[k].size) * p[k].dtype.itemsize for k in keys)
        act_bytes = 4 * rows * (p["fin_p"] + hid_p + d * p["fout_p"])
        if weight_bytes + wb + act_bytes > budget:
            break
        weight_bytes += wb
        rows *= d
        n_fuse += 1
    return n_fuse


# ------------------ static row-permutation bookkeeping (numpy) -----------------

def _init_perm(n_rows, n_valid):
    perm = np.full((n_rows,), _SENT, dtype=np.int64)
    perm[:n_valid] = np.arange(n_valid, dtype=np.int64)
    return perm


def _compose_perm(perm, degree):
    """Kernel rows are child-major: new_row = child*M + r; true index = perm[r]*degree + child."""
    valid = perm != _SENT
    base = (np.where(valid, perm, 0)[None, :] * degree
            + np.arange(degree, dtype=np.int64)[:, None])
    return np.where(valid[None, :], base, _SENT).reshape(-1)


# --------------------------- generator forward --------------------------------

def prepare_params(params, degrees, mxu_dtype=jnp.bfloat16):
    """Zero-pad every feature dim to a multiple of 128 and cast MXU operands."""
    prepped = []
    for p, degree in zip(params, degrees):
        fin, fout = p["W_root"].shape
        hid = p["W1"].shape[1]
        fin_p, fout_p, hid_p = (_round_up(fin, _LANE), _round_up(fout, _LANE),
                                _round_up(hid, _LANE))

        def pad2(w, r, c):
            return jnp.pad(w, ((0, r - w.shape[0]), (0, c - w.shape[1])))

        q = {
            "W_root": pad2(p["W_root"], fin_p, fout_p).astype(mxu_dtype),
            "W1": pad2(p["W1"], fin_p, hid_p).astype(mxu_dtype),
            "W2": pad2(p["W2"], hid_p, fout_p).astype(mxu_dtype),
            "bias": jnp.pad(p["bias"], ((0, 0), (0, fout_p - fout))).astype(jnp.float32),
            "fin": fin, "fout": fout, "fin_p": fin_p, "fout_p": fout_p,
        }
        if degree > 1:
            wb = p["W_branch"].reshape(fin, degree, fin)
            wb = jnp.pad(wb, ((0, fin_p - fin), (0, 0), (0, fin_p - fin)))
            q["W_branch"] = wb.reshape(fin_p, degree * fin_p).astype(mxu_dtype)
        prepped.append(q)
    return prepped


def tree_gcn_generator_forward(z, prepped, degrees, act_dtype=None):
    """z: (B, N0, fin0) -> (B, N0 * prod(degrees), fout_last), float32."""
    # TODO(synk): jit the whole wrapper (degrees / padded dims are static) so the
    # tiny pad / reshape / final gather glue fuses around the pallas calls.
    B, n0, fin0 = z.shape
    n_layers = len(prepped)
    fin0_p = prepped[0]["fin_p"]
    if act_dtype is None:
        act_dtype = prepped[0]["W_root"].dtype   # inter-layer activations in MXU dtype
    rows0 = B * n0
    m0 = _round_up(max(rows0, _SUB), _SUB)       # pad rows to a multiple of 8 once
    x2d = jnp.pad(z.reshape(rows0, fin0),
                  ((0, m0 - rows0), (0, fin0_p - fin0))).astype(act_dtype)
    perm = _init_perm(m0, rows0)

    n_fuse = _fused_prefix_len(prepped, degrees, m0)
    if n_fuse > 0:
        x2d = _fused_prefix(x2d, prepped[:n_fuse], degrees[:n_fuse], act_dtype)
        for d in degrees[:n_fuse]:
            perm = _compose_perm(perm, d)

    for i in range(n_fuse, n_layers):
        p, degree = prepped[i], degrees[i]
        activation = i != n_layers - 1
        out_dtype = jnp.float32 if i == n_layers - 1 else act_dtype
        if degree > 1:
            x2d = _upsample_layer(x2d, p, degree, activation, out_dtype)
            perm = _compose_perm(perm, degree)
        else:
            x2d = _plain_layer(x2d, p, activation, out_dtype)

    # Slice to the true (tiny) channel count FIRST, then one gather undoes the
    # composed child-major ordering and drops the padded rows.
    fout = prepped[-1]["fout"]
    total = rows0 * int(np.prod(np.asarray(degrees, dtype=np.int64)))
    order = np.argsort(perm, kind="stable")[:total].astype(np.int32)
    pts = jnp.take(x2d[:, :fout], jnp.asarray(order), axis=0)
    return pts.reshape(B, total // B, fout).astype(jnp.float32)


# -------------------- pure-JAX reference (mirrors PyTorch) ---------------------

def _ref_layer(x, p, degree, activation, mxu_dtype):
    b, n, fin = x.shape
    fout = p["W_root"].shape[1]

    def mm(a, w):
        return jnp.dot(a.astype(mxu_dtype), w.astype(mxu_dtype),
                       preferred_element_type=jnp.float32,
                       precision=jax.lax.Precision.HIGHEST)

    def w_loop(v2d):
        return mm(_leaky(mm(v2d, p["W1"])), p["W2"])

    root = mm(x.reshape(-1, fin), p["W_root"]).reshape(b, n, fout)
    if degree > 1:
        branch = mm(x.reshape(-1, fin), p["W_branch"]).reshape(b, n * degree, fin)
        branch = w_loop(branch.reshape(-1, fin)).reshape(b, n * degree, fout)
        root = jnp.broadcast_to(root[:, :, None, :],
                                (b, n, degree, fout)).reshape(b, n * degree, fout)
        combined = root + branch
    else:
        combined = root + w_loop(x.reshape(-1, fin)).reshape(b, n, fout)
    out = combined + p["bias"]
    if activation:
        out = _leaky(out)
    return out


def _ref_forward(z, params, degrees, mxu_dtype=jnp.float32):
    x = z
    n_layers = len(params)
    for i, (p, degree) in enumerate(zip(params, degrees)):
        x = _ref_layer(x, p, degree, activation=(i != n_layers - 1), mxu_dtype=mxu_dtype)
    return x


# ------------------------ deterministic parameter init -------------------------

def init_params(key, features, degrees, support):
    params = []
    n_layers = len(features) - 1
    for i in range(n_layers):
        fin, fout, degree = features[i], features[i + 1], degrees[i]
        key, k1, k2, k3, k4, k5 = jax.random.split(key, 6)
        p = {
            # pre-transposed nn.Linear weights: (in, out)
            "W_root": 0.1 * jax.random.normal(k1, (fin, fout), jnp.float32),
            "W1": 0.1 * jax.random.normal(k2, (fin, fin * support), jnp.float32),
            "W2": 0.1 * jax.random.normal(k3, (fin * support, fout), jnp.float32),
            "bias": jax.random.uniform(k4, (1, fout), jnp.float32,
                                       -1.0 / math.sqrt(fout), 1.0 / math.sqrt(fout)),
        }
        if degree > 1:
            p["W_branch"] = 0.1 * jax.random.normal(k5, (fin, fin * degree), jnp.float32)
        params.append(p)
    return params


if __name__ == "__main__":
    # Small config consistent with the module (full model:
    # features=[128,256,256,256,128,128,128,3], degrees=[1,2,2,2,2,2,64], support=10).
    features = [32, 64, 32, 3]
    degrees = [1, 2, 4]          # final node count = 1 * 2 * 4 = 8
    support = 4
    B = 2

    key = jax.random.PRNGKey(0)
    key, kz, kp = jax.random.split(key, 3)
    z = jax.random.normal(kz, (B, 1, features[0]), jnp.float32)
    params = init_params(kp, features, degrees, support)

    ref_f32 = _ref_forward(z, params, degrees, mxu_dtype=jnp.float32)

    # 1) f32-MXU path: faithful to the PyTorch module.
    prepped_f32 = prepare_params(params, degrees, mxu_dtype=jnp.float32)
    out_f32 = jax.block_until_ready(tree_gcn_generator_forward(z, prepped_f32, degrees))
    assert out_f32.shape == (B, 8, 3), out_f32.shape
    err = float(jnp.max(jnp.abs(out_f32 - ref_f32)))
    assert jnp.allclose(out_f32, ref_f32, rtol=2e-3, atol=2e-3), f"f32 max abs diff {err}"

    # 2) bf16-MXU + bf16 inter-layer activations (recommended on v5e/v6e/v7x):
    #    validated against a reference applying the same bf16 casts at matmul
    #    boundaries with f32 accumulation.
    prepped_bf16 = prepare_params(params, degrees, mxu_dtype=jnp.bfloat16)
    out_bf16 = jax.block_until_ready(tree_gcn_generator_forward(z, prepped_bf16, degrees))
    ref_bf16 = _ref_forward(z, params, degrees, mxu_dtype=jnp.bfloat16)
    assert out_bf16.shape == (B, 8, 3), out_bf16.shape
    err_bf = float(jnp.max(jnp.abs(out_bf16 - ref_bf16)))
    assert jnp.allclose(out_bf16, ref_bf16, rtol=5e-3, atol=5e-3), f"bf16 max abs diff {err_bf}"

    print("KERNEL_OK")
</pallas_src>

<mosaic_0001>
module attributes {stable_mosaic.version = 11 : i64} {
  func.func @fused_prefix_kernel(%arg0: i32, %arg1: memref<8x128xf32, #tpu.memory_space<vmem>>, %arg2: memref<128x128xf32, #tpu.memory_space<vmem>>, %arg3: memref<128x128xf32, #tpu.memory_space<vmem>>, %arg4: memref<128x128xf32, #tpu.memory_space<vmem>>, %arg5: memref<1x128xf32, #tpu.memory_space<vmem>>, %arg6: memref<128x128xf32, #tpu.memory_space<vmem>>, %arg7: memref<128x256xf32, #tpu.memory_space<vmem>>, %arg8: memref<128x256xf32, #tpu.memory_space<vmem>>, %arg9: memref<256x128xf32, #tpu.memory_space<vmem>>, %arg10: memref<1x128xf32, #tpu.memory_space<vmem>>, %arg11: memref<16x128xf32, #tpu.memory_space<vmem>>) attributes {dimension_semantics = [#tpu.dimension_semantics<arbitrary>], iteration_bounds = array<i64: 1>, scalar_prefetch = 0 : i64, scratch_operands = 0 : i64, tpu.core_type = #tpu.core_type<tc>, window_params = [{pipeline_mode = #tpu.pipeline_mode<synchronous>, transform_indices = @transform_0, window_bounds = array<i64: 8, 128>}, {pipeline_mode = #tpu.pipeline_mode<synchronous>, transform_indices = @transform_1, window_bounds = array<i64: 128, 128>}, {pipeline_mode = #tpu.pipeline_mode<synchronous>, transform_indices = @transform_2, window_bounds = array<i64: 128, 128>}, {pipeline_mode = #tpu.pipeline_mode<synchronous>, transform_indices = @transform_3, window_bounds = array<i64: 128, 128>}, {pipeline_mode = #tpu.pipeline_mode<synchronous>, transform_indices = @transform_4, window_bounds = array<i64: 1, 128>}, {pipeline_mode = #tpu.pipeline_mode<synchronous>, transform_indices = @transform_5, window_bounds = array<i64: 128, 128>}, {pipeline_mode = #tpu.pipeline_mode<synchronous>, transform_indices = @transform_6, window_bounds = array<i64: 128, 256>}, {pipeline_mode = #tpu.pipeline_mode<synchronous>, transform_indices = @transform_7, window_bounds = array<i64: 128, 256>}, {pipeline_mode = #tpu.pipeline_mode<synchronous>, transform_indices = @transform_8, window_bounds = array<i64: 256, 128>}, {pipeline_mode = #tpu.pipeline_mode<synchronous>, transform_indices = @transform_9, window_bounds = array<i64: 1, 128>}, {pipeline_mode = #tpu.pipeline_mode<synchronous>, transform_indices = @transform_10, window_bounds = array<i64: 16, 128>}]} {
    %c0 = arith.constant 0 : index
    %c0_0 = arith.constant 0 : index
    %0 = vector.load %arg1[%c0, %c0_0] : memref<8x128xf32, #tpu.memory_space<vmem>>, vector<8x128xf32>
    %c0_1 = arith.constant 0 : index
    %c0_2 = arith.constant 0 : index
    %1 = vector.load %arg2[%c0_1, %c0_2] : memref<128x128xf32, #tpu.memory_space<vmem>>, vector<128x128xf32>
    %cst = arith.constant dense<0.000000e+00> : vector<8x128xf32>
    %2 = tpu.matmul %0, %1, %cst {dimension_numbers = #tpu.dot_dimension_numbers<[1], [0], [0], [1], [0, 0, 1, 1], [], []>} : vector<8x128xf32>, vector<128x128xf32>, vector<8x128xf32> -> vector<8x128xf32>
    %c0_3 = arith.constant 0 : index
    %c0_4 = arith.constant 0 : index
    %3 = vector.load %arg5[%c0_3, %c0_4] : memref<1x128xf32, #tpu.memory_space<vmem>>, vector<1x128xf32>
    %4 = vector.broadcast %3 : vector<1x128xf32> to vector<8x128xf32>
    %5 = arith.addf %2, %4 : vector<8x128xf32>
    %c0_5 = arith.constant 0 : index
    %c0_6 = arith.constant 0 : index
    %6 = vector.load %arg3[%c0_5, %c0_6] : memref<128x128xf32, #tpu.memory_space<vmem>>, vector<128x128xf32>
    %cst_7 = arith.constant dense<0.000000e+00> : vector<8x128xf32>
    %7 = tpu.matmul %0, %6, %cst_7 {dimension_numbers = #tpu.dot_dimension_numbers<[1], [0], [0], [1], [0, 0, 1, 1], [], []>} : vector<8x128xf32>, vector<128x128xf32>, vector<8x128xf32> -> vector<8x128xf32>
    %cst_8 = arith.constant 0.000000e+00 : f32
    %8 = vector.broadcast %cst_8 : f32 to vector<8x128xf32>
    %9 = arith.cmpf ogt, %7, %8 : vector<8x128xf32>
    %cst_9 = arith.constant 2.000000e-01 : f32
    %10 = vector.broadcast %cst_9 : f32 to vector<8x128xf32>
    %11 = arith.mulf %10, %7 : vector<8x128xf32>
    %12 = arith.select %9, %7, %11 : vector<8x128xi1>, vector<8x128xf32>
    %c0_10 = arith.constant 0 : index
    %c0_11 = arith.constant 0 : index
    %13 = vector.load %arg4[%c0_10, %c0_11] : memref<128x128xf32, #tpu.memory_space<vmem>>, vector<128x128xf32>
    %cst_12 = arith.constant dense<0.000000e+00> : vector<8x128xf32>
    %14 = tpu.matmul %12, %13, %cst_12 {dimension_numbers = #tpu.dot_dimension_numbers<[1], [0], [0], [1], [0, 0, 1, 1], [], []>} : vector<8x128xf32>, vector<128x128xf32>, vector<8x128xf32> -> vector<8x128xf32>
    %15 = arith.addf %14, %5 : vector<8x128xf32>
    %cst_13 = arith.constant 0.000000e+00 : f32
    %16 = vector.broadcast %cst_13 : f32 to vector<8x128xf32>
    %17 = arith.cmpf ogt, %15, %16 : vector<8x128xf32>
    %cst_14 = arith.constant 2.000000e-01 : f32
    %18 = vector.broadcast %cst_14 : f32 to vector<8x128xf32>
    %19 = arith.mulf %18, %15 : vector<8x128xf32>
    %20 = arith.select %17, %15, %19 : vector<8x128xi1>, vector<8x128xf32>
    %c0_15 = arith.constant 0 : index
    %c0_16 = arith.constant 0 : index
    %21 = vector.load %arg6[%c0_15, %c0_16] : memref<128x128xf32, #tpu.memory_space<vmem>>, vector<128x128xf32>
    %cst_17 = arith.constant dense<0.000000e+00> : vector<8x128xf32>
    %22 = tpu.matmul %20, %21, %cst_17 {dimension_numbers = #tpu.dot_dimension_numbers<[1], [0], [0], [1], [0, 0, 1, 1], [], []>} : vector<8x128xf32>, vector<128x128xf32>, vector<8x128xf32> -> vector<8x128xf32>
    %c0_18 = arith.constant 0 : index
    %c0_19 = arith.constant 0 : index
    %23 = vector.load %arg10[%c0_18, %c0_19] : memref<1x128xf32, #tpu.memory_space<vmem>>, vector<1x128xf32>
    %24 = vector.broadcast %23 : vector<1x128xf32> to vector<8x128xf32>
    %25 = arith.addf %22, %24 : vector<8x128xf32>
    %c0_20 = arith.constant 0 : index
    %c0_21 = arith.constant 0 : index
    %26 = vector.load %arg7[%c0_20, %c0_21] : memref<128x256xf32, #tpu.memory_space<vmem>>, vector<128x256xf32>
    %cst_22 = arith.constant dense<0.000000e+00> : vector<8x256xf32>
    %27 = tpu.matmul %20, %26, %cst_22 {dimension_numbers = #tpu.dot_dimension_numbers<[1], [0], [0], [1], [0, 0, 1, 1], [], []>} : vector<8x128xf32>, vector<128x256xf32>, vector<8x256xf32> -> vector<8x256xf32>
    %28 = vector.extract_strided_slice %27 {offsets = [0, 0], sizes = [8, 128], strides = [1, 1]} : vector<8x256xf32> to vector<8x128xf32>
    %c0_23 = arith.constant 0 : index
    %c0_24 = arith.constant 0 : index
    %29 = vector.load %arg8[%c0_23, %c0_24] : memref<128x256xf32, #tpu.memory_space<vmem>>, vector<128x256xf32>
    %cst_25 = arith.constant dense<0.000000e+00> : vector<8x256xf32>
    %30 = tpu.matmul %28, %29, %cst_25 {dimension_numbers = #tpu.dot_dimension_numbers<[1], [0], [0], [1], [0, 0, 1, 1], [], []>} : vector<8x128xf32>, vector<128x256xf32>, vector<8x256xf32> -> vector<8x256xf32>
    %cst_26 = arith.constant 0.000000e+00 : f32
    %31 = vector.broadcast %cst_26 : f32 to vector<8x256xf32>
    %32 = arith.cmpf ogt, %30, %31 : vector<8x256xf32>
    %cst_27 = arith.constant 2.000000e-01 : f32
    %33 = vector.broadcast %cst_27 : f32 to vector<8x256xf32>
    %34 = arith.mulf %33, %30 : vector<8x256xf32>
    %35 = arith.select %32, %30, %34 : vector<8x256xi1>, vector<8x256xf32>
    %c0_28 = arith.constant 0 : index
    %c0_29 = arith.constant 0 : index
    %36 = vector.load %arg9[%c0_28, %c0_29] : memref<256x128xf32, #tpu.memory_space<vmem>>, vector<256x128xf32>
    %cst_30 = arith.constant dense<0.000000e+00> : vector<8x128xf32>
    %37 = tpu.matmul %35, %36, %cst_30 {dimension_numbers = #tpu.dot_dimension_numbers<[1], [0], [0], [1], [0, 0, 1, 1], [], []>} : vector<8x256xf32>, vector<256x128xf32>, vector<8x128xf32> -> vector<8x128xf32>
    %38 = arith.addf %37, %25 : vector<8x128xf32>
    %39 = vector.extract_strided_slice %27 {offsets = [0, 128], sizes = [8, 128], strides = [1, 1]} : vector<8x256xf32> to vector<8x128xf32>
    %c0_31 = arith.constant 0 : index
    %c0_32 = arith.constant 0 : index
    %40 = vector.load %arg8[%c0_31, %c0_32] : memref<128x256xf32, #tpu.memory_space<vmem>>, vector<128x256xf32>
    %cst_33 = arith.constant dense<0.000000e+00> : vector<8x256xf32>
    %41 = tpu.matmul %39, %40, %cst_33 {dimension_numbers = #tpu.dot_dimension_numbers<[1], [0], [0], [1], [0, 0, 1, 1], [], []>} : vector<8x128xf32>, vector<128x256xf32>, vector<8x256xf32> -> vector<8x256xf32>
    %cst_34 = arith.constant 0.000000e+00 : f32
    %42 = vector.broadcast %cst_34 : f32 to vector<8x256xf32>
    %43 = arith.cmpf ogt, %41, %42 : vector<8x256xf32>
    %cst_35 = arith.constant 2.000000e-01 : f32
    %44 = vector.broadcast %cst_35 : f32 to vector<8x256xf32>
    %45 = arith.mulf %44, %41 : vector<8x256xf32>
    %46 = arith.select %43, %41, %45 : vector<8x256xi1>, vector<8x256xf32>
    %c0_36 = arith.constant 0 : index
    %c0_37 = arith.constant 0 : index
    %47 = vector.load %arg9[%c0_36, %c0_37] : memref<256x128xf32, #tpu.memory_space<vmem>>, vector<256x128xf32>
    %cst_38 = arith.constant dense<0.000000e+00> : vector<8x128xf32>
    %48 = tpu.matmul %46, %47, %cst_38 {dimension_numbers = #tpu.dot_dimension_numbers<[1], [0], [0], [1], [0, 0, 1, 1], [], []>} : vector<8x256xf32>, vector<256x128xf32>, vector<8x128xf32> -> vector<8x128xf32>
    %49 = arith.addf %48, %25 : vector<8x128xf32>
    %50 = tpu.concatenate %38, %49 in 0 : vector<8x128xf32>, vector<8x128xf32> -> vector<16x128xf32>
    %cst_39 = arith.constant 0.000000e+00 : f32
    %51 = vector.broadcast %cst_39 : f32 to vector<16x128xf32>
    %52 = arith.cmpf ogt, %50, %51 : vector<16x128xf32>
    %cst_40 = arith.constant 2.000000e-01 : f32
    %53 = vector.broadcast %cst_40 : f32 to vector<16x128xf32>
    %54 = arith.mulf %53, %50 : vector<16x128xf32>
    %55 = arith.select %52, %50, %54 : vector<16x128xi1>, vector<16x128xf32>
    %c0_41 = arith.constant 0 : index
    %c0_42 = arith.constant 0 : index
    %56 = vector.load %arg11[%c0_41, %c0_42] : memref<16x128xf32, #tpu.memory_space<vmem>>, vector<16x128xf32>
    tpu.vector_store %arg11[%c0_41, %c0_42], %55 {strides = array<i32>} : memref<16x128xf32, #tpu.memory_space<vmem>>, vector<16x128xf32>,
    return
  }
  func.func @transform_0(%arg0: i32) -> (i32, i32) {
    %c0_i32 = arith.constant 0 : i32
    %c0_i32_0 = arith.constant 0 : i32
    %c0_i32_1 = arith.constant 0 : i32
    return %c0_i32, %c0_i32_0 : i32, i32
  }
  func.func @transform_1(%arg0: i32) -> (i32, i32) {
    %c0_i32 = arith.constant 0 : i32
    %c0_i32_0 = arith.constant 0 : i32
    %c0_i32_1 = arith.constant 0 : i32
    return %c0_i32, %c0_i32_0 : i32, i32
  }
  func.func @transform_2(%arg0: i32) -> (i32, i32) {
    %c0_i32 = arith.constant 0 : i32
    %c0_i32_0 = arith.constant 0 : i32
    %c0_i32_1 = arith.constant 0 : i32
    return %c0_i32, %c0_i32_0 : i32, i32
  }
  func.func @transform_3(%arg0: i32) -> (i32, i32) {
    %c0_i32 = arith.constant 0 : i32
    %c0_i32_0 = arith.constant 0 : i32
    %c0_i32_1 = arith.constant 0 : i32
    return %c0_i32, %c0_i32_0 : i32, i32
  }
  func.func @transform_4(%arg0: i32) -> (i32, i32) {
    %c0_i32 = arith.constant 0 : i32
    %c0_i32_0 = arith.constant 0 : i32
    %c0_i32_1 = arith.constant 0 : i32
    return %c0_i32, %c0_i32_0 : i32, i32
  }
  func.func @transform_5(%arg0: i32) -> (i32, i32) {
    %c0_i32 = arith.constant 0 : i32
    %c0_i32_0 = arith.constant 0 : i32
    %c0_i32_1 = arith.constant 0 : i32
    return %c0_i32, %c0_i32_0 : i32, i32
  }
  func.func @transform_6(%arg0: i32) -> (i32, i32) {
    %c0_i32 = arith.constant 0 : i32
    %c0_i32_0 = arith.constant 0 : i32
    %c0_i32_1 = arith.constant 0 : i32
    return %c0_i32, %c0_i32_0 : i32, i32
  }
  func.func @transform_7(%arg0: i32) -> (i32, i32) {
    %c0_i32 = arith.constant 0 : i32
    %c0_i32_0 = arith.constant 0 : i32
    %c0_i32_1 = arith.constant 0 : i32
    return %c0_i32, %c0_i32_0 : i32, i32
  }
  func.func @transform_8(%arg0: i32) -> (i32, i32) {
    %c0_i32 = arith.constant 0 : i32
    %c0_i32_0 = arith.constant 0 : i32
    %c0_i32_1 = arith.constant 0 : i32
    return %c0_i32, %c0_i32_0 : i32, i32
  }
  func.func @transform_9(%arg0: i32) -> (i32, i32) {
    %c0_i32 = arith.constant 0 : i32
    %c0_i32_0 = arith.constant 0 : i32
    %c0_i32_1 = arith.constant 0 : i32
    return %c0_i32, %c0_i32_0 : i32, i32
  }
  func.func @transform_10(%arg0: i32) -> (i32, i32) {
    %c0_i32 = arith.constant 0 : i32
    %c0_i32_0 = arith.constant 0 : i32
    %c0_i32_1 = arith.constant 0 : i32
    return %c0_i32, %c0_i32_0 : i32, i32
  }
}

</mosaic_0001>

<bundles_post_ra>
// kernel: tpu_custom_call.1
= control target key start
LH: loop header
LB: loop body
LE: loop exit
PB: predicated region body
PF: predicated region fallthrough
CT: control target
= control target key end

     0   :  { %15 = vsyncpa [#allocation3], 0  ;;  %s2126_s0 = inlined_call_operand.hbm [shape: f32[8,128], index: 0, kind: input, shape index: {}]   ;;  %s2127_s1 = inlined_call_operand.hbm [shape: f32[128,128], index: 1, kind: input, shape index: {}]   ;;  %s2128_s2 = inlined_call_operand.hbm [shape: f32[128,128], index: 2, kind: input, shape index: {}]   ;;  %s2129_s3 = inlined_call_operand.hbm [shape: f32[128,128], index: 3, kind: input, shape index: {}]   ;;  %s2130_s4 = inlined_call_operand.vmem [shape: f32[1,128], index: 4, kind: input, shape index: {}]   ;;  %s2131_s5 = inlined_call_operand.hbm [shape: f32[128,128], index: 5, kind: input, shape index: {}]   ;;  %s2132_s6 = inlined_call_operand.hbm [shape: f32[128,256], index: 6, kind: input, shape index: {}]   ;;  %s2133_s7 = inlined_call_operand.hbm [shape: f32[128,256], index: 7, kind: input, shape index: {}]   ;;  %s2134_s8 = inlined_call_operand.hbm [shape: f32[256,128], index: 8, kind: input, shape index: {}]   ;;  %s2135_s9 = inlined_call_operand.vmem [shape: f32[1,128], index: 9, kind: input, shape index: {}]   ;;  %s2136_s10 = inlined_call_operand.hbm [shape: f32[16,128], index: 10, kind: output, shape index: {}]  }
   0x1   :  { %16 = vsyncpa [#allocation6], 0 }
   0x2   :  { %17 = vsyncpa [#allocation9], 0 }
   0x3   :  { %18 = vsyncpa [#allocation12], 0 }
   0x4   :  { %19 = vsyncpa [#allocation15], 0 }
   0x5   :  { %20 = vsyncpa [#allocation4], 0  ;;  %s1763_s13 = smov [#allocation5]   ;;  %s1553_s17 = scalar_lea.hbm %s2127_s1, 2048 }
   0x6   :  { %s36_s14 = sshll.u32 %s1763_s13, 4  ;;  %p1554_p0 = scmp.ne.s32.totalorder %s2127_s1, %s1553_s17  ;;  %s37_s14 = int_to_ptr.vmem [resolvable:$true] %s36_s14 }
   0x7   :  { %p1557_p1 = scmp.lt.u32.totalorder %s1553_s17, %s2127_s1 }
   0x9   :  { %p1559_p2 = pnand %p1557_p1, %p1554_p0 }
   0xb   :  { %1562 = shalt.err (!%p1559_p2)
}
   0xc   :  { %s1563_s22 = scalar_lea.vmem %s37_s14, 2048  ;;  %p1568_p4 = scmp.lt.s32.totalorder %s37_s14, %s37_s14 }
   0xd   :  { %p1564_p3 = scmp.ne.s32.totalorder %s37_s14, %s1563_s22  ;;  %p1569_p5 = scmp.lt.s32.totalorder %s1563_s22, %s1563_s22 }
   0xf   :  { %p1570_p6 = por %p1569_p5, %p1568_p4 }
  0x11   :  { %p1571_p7 = pnand %p1570_p6, %p1564_p3 }
  0x13   :  { %1574 = shalt.err (!%p1571_p7)
}
  0x14   :  { %s1764_s23 = smov 128   ;;  %s1765_s24 = smov 8  }
  0x15   :  { %42 = dma.hbm_to_vmem [thread:$0]  %s2127_s1, 2048, %s37_s14, [#allocation6], %s1764_s23, %s1764_s23, %s1765_s24  }
  0x16   :  { %s1766_s27 = smov [#allocation8]   ;;  %s1767_s29 = smov [#allocation11]  }
  0x17   :  { %s60_s28 = sshll.u32 %s1766_s27, 4  ;;  %s86_s30 = sshll.u32 %s1767_s29, 4  ;;  %s61_s28 = int_to_ptr.vmem [resolvable:$true] %s60_s28  ;;  %s87_s30 = int_to_ptr.vmem [resolvable:$true] %s86_s30 }
  0x18   :  { %s1575_s13 = scalar_lea.hbm %s2129_s3, 2048 }
  0x19   :  { %p1576_p8 = scmp.ne.s32.totalorder %s2129_s3, %s1575_s13  ;;  %p1579_p9 = scmp.lt.u32.totalorder %s1575_s13, %s2129_s3 }
  0x1b   :  { %p1581_p10 = pnand %p1579_p9, %p1576_p8 }
  0x1d   :  { %1584 = shalt.err (!%p1581_p10)
}
  0x1e   :  { %s1585_s1 = scalar_lea.vmem %s61_s28, 2048  ;;  %p1590_p12 = scmp.lt.s32.totalorder %s61_s28, %s61_s28 }
  0x1f   :  { %p1586_p11 = scmp.ne.s32.totalorder %s61_s28, %s1585_s1  ;;  %p1591_p13 = scmp.lt.s32.totalorder %s1585_s1, %s1585_s1 }
  0x21   :  { %p1592_p0 = por %p1591_p13, %p1590_p12 }
  0x23   :  { %p1593_p1 = pnand %p1592_p0, %p1586_p11 }
  0x25   :  { %1596 = shalt.err (!%p1593_p1)
}
  0x26   :  { %66 = dma.hbm_to_vmem [thread:$0]  %s2129_s3, 2048, %s61_s28, [#allocation9], %s1764_s23, %s1764_s23, %s1765_s24  }
  0x27   :  { %s1597_s22 = scalar_lea.hbm %s2132_s6, 4096 }
  0x28   :  { %p1598_p2 = scmp.ne.s32.totalorder %s2132_s6, %s1597_s22  ;;  %p1601_p3 = scmp.lt.u32.totalorder %s1597_s22, %s2132_s6 }
  0x2a   :  { %p1603_p4 = pnand %p1601_p3, %p1598_p2 }
  0x2c   :  { %1606 = shalt.err (!%p1603_p4)
}
  0x2d   :  { %s1607_s11 = scalar_lea.vmem %s87_s30, 4096  ;;  %p1612_p6 = scmp.lt.s32.totalorder %s87_s30, %s87_s30 }
  0x2e   :  { %p1608_p5 = scmp.ne.s32.totalorder %s87_s30, %s1607_s11  ;;  %p1613_p7 = scmp.lt.s32.totalorder %s1607_s11, %s1607_s11 }
  0x30   :  { %p1614_p8 = por %p1613_p7, %p1612_p6 }
  0x32   :  { %p1615_p9 = pnand %p1614_p8, %p1608_p5 }
  0x34   :  { %1618 = shalt.err (!%p1615_p9)
}
  0x35   :  { %s1768_s3 = smov 256   ;;  %s1769_s28 = smov 16  }
  0x36   :  { %92 = dma.hbm_to_vmem [thread:$0]  %s2132_s6, 4096, %s87_s30, [#allocation12], %s1768_s3, %s1768_s3, %s1769_s28  }
  0x37   :  { %s1770_s15 = smov [#allocation2]   ;;  %s1771_s17 = smov [#allocation7]  }
  0x38   :  { %s27_s16 = sshll.u32 %s1770_s15, 4  ;;  %s48_s18 = sshll.u32 %s1771_s17, 4  ;;  %s28_s16 = int_to_ptr.vmem [resolvable:$true] %s27_s16  ;;  %s49_s18 = int_to_ptr.vmem [resolvable:$true] %s48_s18 }
  0x39   :  { %s1619_s19 = scalar_lea.hbm %s2126_s0, 128 }
  0x3a   :  { %p1620_p10 = scmp.ne.s32.totalorder %s2126_s0, %s1619_s19  ;;  %p1623_p11 = scmp.lt.u32.totalorder %s1619_s19, %s2126_s0 }
  0x3c   :  { %p1625_p12 = pnand %p1623_p11, %p1620_p10 }
  0x3e   :  { %1628 = shalt.err (!%p1625_p12)
}
  0x3f   :  { %s1629_s6 = scalar_lea.vmem %s28_s16, 128  ;;  %p1634_p0 = scmp.lt.s32.totalorder %s28_s16, %s28_s16 }
  0x40   :  { %p1630_p13 = scmp.ne.s32.totalorder %s28_s16, %s1629_s6  ;;  %p1635_p1 = scmp.lt.s32.totalorder %s1629_s6, %s1629_s6 }
  0x42   :  { %p1636_p2 = por %p1635_p1, %p1634_p0 }
  0x44   :  { %p1637_p3 = pnand %p1636_p2, %p1630_p13 }
  0x46   :  { %1640 = shalt.err (!%p1637_p3)
}
  0x47   :  { %30 = dma.hbm_to_vmem [thread:$0]  %s2126_s0, 128, %s28_s16, [#allocation3]  }
  0x48   :  { %s1641_s11 = scalar_lea.hbm %s2128_s2, 2048 }
  0x49   :  { %p1642_p4 = scmp.ne.s32.totalorder %s2128_s2, %s1641_s11  ;;  %p1645_p5 = scmp.lt.u32.totalorder %s1641_s11, %s2128_s2 }
  0x4b   :  { %p1647_p6 = pnand %p1645_p5, %p1642_p4 }
  0x4d   :  { %1650 = shalt.err (!%p1647_p6)
}
  0x4e   :  { %s1651_s1 = scalar_lea.vmem %s49_s18, 2048  ;;  %p1656_p8 = scmp.lt.s32.totalorder %s49_s18, %s49_s18 }
  0x4f   :  { %p1652_p7 = scmp.ne.s32.totalorder %s49_s18, %s1651_s1  ;;  %p1657_p9 = scmp.lt.s32.totalorder %s1651_s1, %s1651_s1 }
  0x51   :  { %p1658_p10 = por %p1657_p9, %p1656_p8 }
  0x53   :  { %p1659_p11 = pnand %p1658_p10, %p1652_p7 }
  0x55   :  { %1662 = shalt.err (!%p1659_p11)
}
  0x56   :  { %54 = dma.hbm_to_vmem [thread:$0]  %s2128_s2, 2048, %s49_s18, [#allocation6], %s1764_s23, %s1764_s23, %s1765_s24  }
  0x57   :  { %s1772_s14 = smov [#allocation10]   ;;  %s1773_s20 = smov [#allocation13]  }
  0x58   :  { %s74_s19 = sshll.u32 %s1772_s14, 4  ;;  %s98_s21 = sshll.u32 %s1773_s20, 4  ;;  %s75_s19 = int_to_ptr.vmem [resolvable:$true] %s74_s19  ;;  %s99_s21 = int_to_ptr.vmem [resolvable:$true] %s98_s21 }
  0x59   :  { %s1663_s6 = scalar_lea.hbm %s2131_s5, 2048 }
  0x5a   :  { %p1664_p12 = scmp.ne.s32.totalorder %s2131_s5, %s1663_s6  ;;  %p1667_p13 = scmp.lt.u32.totalorder %s1663_s6, %s2131_s5 }
  0x5c   :  { %p1669_p0 = pnand %p1667_p13, %p1664_p12 }
  0x5e   :  { %1672 = shalt.err (!%p1669_p0)
}
  0x5f   :  { %s1673_s2 = scalar_lea.vmem %s75_s19, 2048  ;;  %p1678_p2 = scmp.lt.s32.totalorder %s75_s19, %s75_s19 }
  0x60   :  { %p1674_p1 = scmp.ne.s32.totalorder %s75_s19, %s1673_s2  ;;  %p1679_p3 = scmp.lt.s32.totalorder %s1673_s2, %s1673_s2 }
  0x62   :  { %p1680_p4 = por %p1679_p3, %p1678_p2 }
  0x64   :  { %p1681_p5 = pnand %p1680_p4, %p1674_p1 }
  0x66   :  { %1684 = shalt.err (!%p1681_p5)
}
  0x67   :  { %80 = dma.hbm_to_vmem [thread:$0]  %s2131_s5, 2048, %s75_s19, [#allocation9], %s1764_s23, %s1764_s23, %s1765_s24  }
  0x68   :  { %s1685_s15 = scalar_lea.hbm %s2133_s7, 4096 }
  0x69   :  { %p1686_p6 = scmp.ne.s32.totalorder %s2133_s7, %s1685_s15  ;;  %p1689_p7 = scmp.lt.u32.totalorder %s1685_s15, %s2133_s7 }
  0x6b   :  { %p1691_p8 = pnand %p1689_p7, %p1686_p6 }
  0x6d   :  { %1694 = shalt.err (!%p1691_p8)
}
  0x6e   :  { %s1695_s14 = scalar_lea.vmem %s99_s21, 4096  ;;  %p1700_p10 = scmp.lt.s32.totalorder %s99_s21, %s99_s21 }
  0x6f   :  { %p1696_p9 = scmp.ne.s32.totalorder %s99_s21, %s1695_s14  ;;  %p1701_p11 = scmp.lt.s32.totalorder %s1695_s14, %s1695_s14 }
  0x71   :  { %p1702_p12 = por %p1701_p11, %p1700_p10 }
  0x73   :  { %p1703_p13 = pnand %p1702_p12, %p1696_p9 }
  0x75   :  { %1706 = shalt.err (!%p1703_p13)
}
  0x76   :  { %104 = dma.hbm_to_vmem [thread:$0]  %s2133_s7, 4096, %s99_s21, [#allocation12], %s1768_s3, %s1768_s3, %s1769_s28  }
  0x77   :  { %s1774_s20 = smov [#allocation14]   ;;  %s1707_s30 = scalar_lea.hbm %s2134_s8, 4096 }
  0x78   :  { %s110_s22 = sshll.u32 %s1774_s20, 4  ;;  %p1708_p0 = scmp.ne.s32.totalorder %s2134_s8, %s1707_s30  ;;  %s111_s22 = int_to_ptr.vmem [resolvable:$true] %s110_s22 }
  0x79   :  { %p1711_p1 = scmp.lt.u32.totalorder %s1707_s30, %s2134_s8 }
  0x7b   :  { %p1713_p2 = pnand %p1711_p1, %p1708_p0 }
  0x7d   :  { %1716 = shalt.err (!%p1713_p2)
}
  0x7e   :  { %s1717_s18 = scalar_lea.vmem %s111_s22, 4096  ;;  %p1722_p4 = scmp.lt.s32.totalorder %s111_s22, %s111_s22 }
  0x7f   :  { %p1718_p3 = scmp.ne.s32.totalorder %s111_s22, %s1717_s18  ;;  %p1723_p5 = scmp.lt.s32.totalorder %s1717_s18, %s1717_s18 }
  0x81   :  { %p1724_p6 = por %p1723_p5, %p1722_p4 }
  0x83   :  { %p1725_p7 = pnand %p1724_p6, %p1718_p3 }
  0x85   :  { %1728 = shalt.err (!%p1725_p7)
}
  0x86   :  { %116 = dma.hbm_to_vmem [thread:$0]  %s2134_s8, 4096, %s111_s22, [#allocation15], %s1764_s23, %s1764_s23, %s1765_s24  }
  0x87   :  { %1751 = dma.done.wait [#allocation3], 128  }
  0x88   :  { %1752 = vsyncadd [#allocation3], 4294967168 }
  0x89   :  { %1753 = dma.done.wait [#allocation6], 4096  }
  0x8a   :  { %1754 = vsyncadd [#allocation6], 4294963200 }
  0x8b   :  { %1755 = dma.done.wait [#allocation9], 4096  }
  0x8c   :  { %1756 = vsyncadd [#allocation9], 4294963200 }
  0x8d   :  { %1757 = dma.done.wait [#allocation12], 8192  }
  0x8e   :  { %1758 = vsyncadd [#allocation12], 4294959104 }
  0x8f   :  { %1759 = dma.done.wait [#allocation15], 4096  }
  0x90   :  { %1760 = vsyncadd [#allocation15], 4294963200  ;;  %v1775_v0 = vmov 0.0|0.0   ;;  %vm1776_vm0 = vmmov 0   ;;  %v1777_v1 = vmov 0.0   ;;  %v237_v2 = vld [vmem:[#allocation7] sm:$0xff] }
  0x91   :  { %1302 = vmatprep.subr.bf16.mxu1 %v1775_v0  ;;  %1205 = vmatprep.mubr.msk.f32.mxu1 %vm1776_vm0, %v1777_v1  ;;  %v238_v3 = vld [vmem:[#allocation7 + $0x8] sm:$0xff]  ;;  %v239_v4 = vld [vmem:[#allocation7 + $0x10] sm:$0xff]  ;;  %v240_v6 = vld [vmem:[#allocation7 + $0x18] sm:$0xff]  ;;  %s1778_s11 = smov [#allocation16]  }
  0x92   :  { %1278 = vmatprep.subr.bf16.mxu0 %v1775_v0  ;;  %1170 = vmatprep.mubr.msk.f32.mxu0 %vm1776_vm0, %v1777_v1  ;;  %v1303_v5 = vpack.c.bf16 %v238_v3, %v237_v2  ;;  %v1306_v7 = vpack.c.bf16 %v240_v6, %v239_v4  ;;  %v241_v8 = vld [vmem:[#allocation7 + $0x20] sm:$0xff]  ;;  %v242_v9 = vld [vmem:[#allocation7 + $0x28] sm:$0xff]  ;;  %v146_v12 = vld [vmem:[#allocation5 + $0x10] sm:$0xff]  ;;  %s982_s12 = sshll.u32 %s1778_s11, 4  ;;  %s983_s12 = int_to_ptr.vmem [resolvable:$true] %s982_s12 }
  0x93   :  { %v144_v10 = vld [vmem:[#allocation5] sm:$0xff]  ;;  %v145_v11 = vld [vmem:[#allocation5 + $0x8] sm:$0xff]  ;;  %v147_v13 = vld [vmem:[#allocation5 + $0x18] sm:$0xff]  ;;  %v1309_v14 = vpack.c.bf16 %v242_v9, %v241_v8  ;;  %p1734_p9 = scmp.lt.s32.totalorder %s983_s12, %s983_s12 }
  0x94   :  { %1304 = vmatpush3.bf16.msra.mxu1 %v1303_v5  ;;  %v1279_v15 = vpack.c.bf16 %v145_v11, %v144_v10  ;;  %v243_v16 = vld [vmem:[#allocation7 + $0x30] sm:$0xff]  ;;  %v244_v17 = vld [vmem:[#allocation7 + $0x38] sm:$0xff]  ;;  %v1282_v18 = vpack.c.bf16 %v147_v13, %v146_v12  ;;  %v148_v19 = vld [vmem:[#allocation5 + $0x20] sm:$0xff] }
  0x95   :  { %1305 = vmatprep.subr.bf16.mxu1 %v1775_v0  ;;  %v149_v20 = vld [vmem:[#allocation5 + $0x28] sm:$0xff]  ;;  %v1312_v21 = vpack.c.bf16 %v244_v17, %v243_v16  ;;  %v245_v22 = vld [vmem:[#allocation7 + $0x40] sm:$0xff]  ;;  %v150_v25 = vld [vmem:[#allocation5 + $0x30] sm:$0xff] }
  0x96   :  { %1280 = vmatpush3.bf16.msra.mxu0 %v1279_v15  ;;  %v246_v23 = vld [vmem:[#allocation7 + $0x48] sm:$0xff]  ;;  %v1285_v24 = vpack.c.bf16 %v149_v20, %v148_v19  ;;  %v151_v26 = vld [vmem:[#allocation5 + $0x38] sm:$0xff]  ;;  %v247_v28 = vld [vmem:[#allocation7 + $0x50] sm:$0xff] }
  0x97   :  { %1281 = vmatprep.subr.bf16.mxu0 %v1775_v0  ;;  %v1315_v27 = vpack.c.bf16 %v246_v23, %v245_v22  ;;  %v248_v29 = vld [vmem:[#allocation7 + $0x58] sm:$0xff]  ;;  %v1288_v30 = vpack.c.bf16 %v151_v26, %v150_v25  ;;  %v152_v31 = vld [vmem:[#allocation5 + $0x40] sm:$0xff]  ;;  %v153_v32 = vld [vmem:[#allocation5 + $0x48] sm:$0xff] }
  0x98   :  { %1307 = vmatpush3.bf16.msra.mxu1 %v1306_v7  ;;  %v1318_v33 = vpack.c.bf16 %v248_v29, %v247_v28  ;;  %v249_v34 = vld [vmem:[#allocation7 + $0x60] sm:$0xff]  ;;  %v250_v35 = vld [vmem:[#allocation7 + $0x68] sm:$0xff]  ;;  %v1291_v36 = vpack.c.bf16 %v153_v32, %v152_v31  ;;  %v154_v37 = vld [vmem:[#allocation5 + $0x50] sm:$0xff] }
  0x99   :  { %1308 = vmatprep.subr.bf16.mxu1 %v1775_v0  ;;  %v155_v38 = vld [vmem:[#allocation5 + $0x58] sm:$0xff]  ;;  %v1321_v39 = vpack.c.bf16 %v250_v35, %v249_v34  ;;  %v251_v40 = vld [vmem:[#allocation7 + $0x70] sm:$0xff]  ;;  %v156_v43 = vld [vmem:[#allocation5 + $0x60] sm:$0xff] }
  0x9a   :  { %1283 = vmatpush3.bf16.msra.mxu0 %v1282_v18  ;;  %v252_v41 = vld [vmem:[#allocation7 + $0x78] sm:$0xff]  ;;  %v1294_v42 = vpack.c.bf16 %v155_v38, %v154_v37  ;;  %v157_v44 = vld [vmem:[#allocation5 + $0x68] sm:$0xff]  ;;  %v158_v47 = vld [vmem:[#allocation5 + $0x70] sm:$0xff] }
  0x9b   :  { %1284 = vmatprep.subr.bf16.mxu0 %v1775_v0  ;;  %v1324_v45 = vpack.c.bf16 %v252_v41, %v251_v40  ;;  %v1297_v46 = vpack.c.bf16 %v157_v44, %v156_v43  ;;  %v159_v48 = vld [vmem:[#allocation5 + $0x78] sm:$0xff]  ;;  %v326_v51 = vld [vmem:[#allocation8] sm:$0xff]  ;;  %v327_v52 = vld [vmem:[#allocation8 + $0x8] sm:$0xff] }
  0x9c   :  { %1310 = vmatpush3.bf16.msra.mxu1 %v1309_v14  ;;  %v143_v49 = vld [vmem:[#allocation2] sm:$0xff]  ;;  %v1300_v50 = vpack.c.bf16 %v159_v48, %v158_v47  ;;  %v1327_v53 = vpack.c.bf16 %v327_v52, %v326_v51  ;;  %v328_v54 = vld [vmem:[#allocation8 + $0x10] sm:$0xff]  ;;  %v330_v57 = vld [vmem:[#allocation8 + $0x20] sm:$0xff] }
  0x9d   :  { %1311 = vmatprep.subr.bf16.mxu1 %v1775_v0  ;;  %v329_v55 = vld [vmem:[#allocation8 + $0x18] sm:$0xff]  ;;  %v331_v58 = vld [vmem:[#allocation8 + $0x28] sm:$0xff]  ;;  %v332_v60 = vld [vmem:[#allocation8 + $0x30] sm:$0xff] }
  0x9e   :  { %1286 = vmatpush3.bf16.msra.mxu0 %v1285_v24  ;;  %v1330_v56 = vpack.c.bf16 %v329_v55, %v328_v54  ;;  %v1333_v59 = vpack.c.bf16 %v331_v58, %v330_v57  ;;  %v333_v61 = vld [vmem:[#allocation8 + $0x38] sm:$0xff]  ;;  %v334_v63 = vld [vmem:[#allocation8 + $0x40] sm:$0xff]  ;;  %v335_v2 = vld [vmem:[#allocation8 + $0x48] sm:$0xff] }
  0x9f   :  { %1287 = vmatprep.subr.bf16.mxu0 %v1775_v0  ;;  %v1336_v62 = vpack.c.bf16 %v333_v61, %v332_v60  ;;  %v1339_v3 = vpack.c.bf16 %v335_v2, %v334_v63  ;;  %v336_v4 = vld [vmem:[#allocation8 + $0x50] sm:$0xff]  ;;  %v337_v5 = vld [vmem:[#allocation8 + $0x58] sm:$0xff]  ;;  %v338_v7 = vld [vmem:[#allocation8 + $0x60] sm:$0xff] }
  0xa0   :  { %1313 = vmatpush3.bf16.msra.mxu1 %v1312_v21  ;;  %v1342_v6 = vpack.c.bf16 %v337_v5, %v336_v4  ;;  %v339_v8 = vld [vmem:[#allocation8 + $0x68] sm:$0xff]  ;;  %v340_v10 = vld [vmem:[#allocation8 + $0x70] sm:$0xff]  ;;  %v341_v11 = vld [vmem:[#allocation8 + $0x78] sm:$0xff] }
  0xa1   :  { %1314 = vmatprep.subr.bf16.mxu1 %v1775_v0  ;;  %v1345_v9 = vpack.c.bf16 %v339_v8, %v338_v7  ;;  %v1348_v12 = vpack.c.bf16 %v341_v11, %v340_v10  ;;  %v509_v13 = vld [vmem:[#allocation11 + $0x8] sm:$0xff]  ;;  %v511_v14 = vld [vmem:[#allocation11 + $0x18] sm:$0xff]  ;;  %v415_v15 = vld [vmem:[#allocation10] sm:$0xff] }
  0xa2   :  { %1289 = vmatpush3.bf16.msra.mxu0 %v1288_v30  ;;  %v1374_v16 = vpack.c.bf16 %v511_v14, %v509_v13  ;;  %v416_v17 = vld [vmem:[#allocation10 + $0x8] sm:$0xff]  ;;  %v417_v19 = vld [vmem:[#allocation10 + $0x10] sm:$0xff]  ;;  %v418_v20 = vld [vmem:[#allocation10 + $0x18] sm:$0xff] }
  0xa3   :  { %1290 = vmatprep.subr.bf16.mxu0 %v1775_v0  ;;  %v1351_v18 = vpack.c.bf16 %v416_v17, %v415_v15  ;;  %v1354_v21 = vpack.c.bf16 %v418_v20, %v417_v19  ;;  %v419_v22 = vld [vmem:[#allocation10 + $0x20] sm:$0xff]  ;;  %v420_v23 = vld [vmem:[#allocation10 + $0x28] sm:$0xff]  ;;  %v421_v25 = vld [vmem:[#allocation10 + $0x30] sm:$0xff] }
  0xa4   :  { %1316 = vmatpush3.bf16.msra.mxu1 %v1315_v27  ;;  %v1357_v24 = vpack.c.bf16 %v420_v23, %v419_v22  ;;  %v422_v26 = vld [vmem:[#allocation10 + $0x38] sm:$0xff]  ;;  %v423_v28 = vld [vmem:[#allocation10 + $0x40] sm:$0xff]  ;;  %v424_v29 = vld [vmem:[#allocation10 + $0x48] sm:$0xff] }
  0xa5   :  { %1317 = vmatprep.subr.bf16.mxu1 %v1775_v0  ;;  %v1360_v27 = vpack.c.bf16 %v422_v26, %v421_v25  ;;  %v1363_v30 = vpack.c.bf16 %v424_v29, %v423_v28  ;;  %v425_v31 = vld [vmem:[#allocation10 + $0x50] sm:$0xff]  ;;  %v426_v32 = vld [vmem:[#allocation10 + $0x58] sm:$0xff]  ;;  %v427_v34 = vld [vmem:[#allocation10 + $0x60] sm:$0xff] }
  0xa6   :  { %1292 = vmatpush3.bf16.msra.mxu0 %v1291_v36  ;;  %v428_v35 = vld [vmem:[#allocation10 + $0x68] sm:$0xff]  ;;  %v508_v37 = vld [vmem:[#allocation11] sm:$0xff]  ;;  %v510_v38 = vld [vmem:[#allocation11 + $0x10] sm:$0xff] }
  0xa7   :  { %1293 = vmatprep.subr.bf16.mxu0 %v1775_v0  ;;  %v1369_v36 = vpack.c.bf16 %v428_v35, %v427_v34  ;;  %v515_v40 = vld [vmem:[#allocation11 + $0x38] sm:$0xff]  ;;  %v1376_v44 = vpack.c.bf16 %v510_v38, %v508_v37  ;;  %v514_v47 = vld [vmem:[#allocation11 + $0x30] sm:$0xff]  ;;  %v516_v52 = vld [vmem:[#allocation11 + $0x40] sm:$0xff] }
  0xa8   :  { %1319 = vmatpush3.bf16.msra.mxu1 %v1318_v33  ;;  %v1366_v33 = vpack.c.bf16 %v426_v32, %v425_v31  ;;  %v521_v54 = vld [vmem:[#allocation11 + $0x68] sm:$0xff]  ;;  %v523_v55 = vld [vmem:[#allocation11 + $0x78] sm:$0xff]  ;;  %v520_v58 = vld [vmem:[#allocation11 + $0x60] sm:$0xff] }
  0xa9   :  { %1320 = vmatprep.subr.bf16.mxu1 %v1775_v0  ;;  %v1386_v57 = vpack.c.bf16 %v523_v55, %v521_v54  ;;  %v525_v60 = vld [vmem:[#allocation11 + $0x88] sm:$0xff]  ;;  %v527_v61 = vld [vmem:[#allocation11 + $0x98] sm:$0xff]  ;;  %v524_v2 = vld [vmem:[#allocation11 + $0x80] sm:$0xff] }
  0xaa   :  { %1295 = vmatpush3.bf16.msra.mxu0 %v1294_v42  ;;  %v1390_v63 = vpack.c.bf16 %v527_v61, %v525_v60  ;;  %v529_v4 = vld [vmem:[#allocation11 + $0xa8] sm:$0xff]  ;;  %v531_v5 = vld [vmem:[#allocation11 + $0xb8] sm:$0xff]  ;;  %v528_v8 = vld [vmem:[#allocation11 + $0xa0] sm:$0xff] }
  0xab   :  { %1296 = vmatprep.subr.bf16.mxu0 %v1775_v0  ;;  %v1394_v7 = vpack.c.bf16 %v531_v5, %v529_v4  ;;  %v533_v10 = vld [vmem:[#allocation11 + $0xc8] sm:$0xff]  ;;  %v535_v11 = vld [vmem:[#allocation11 + $0xd8] sm:$0xff]  ;;  %v532_v14 = vld [vmem:[#allocation11 + $0xc0] sm:$0xff] }
  0xac   :  { %1322 = vmatpush3.bf16.msra.mxu1 %v1321_v39  ;;  %v513_v39 = vld [vmem:[#allocation11 + $0x28] sm:$0xff]  ;;  %v1398_v13 = vpack.c.bf16 %v535_v11, %v533_v10  ;;  %v534_v15 = vld [vmem:[#allocation11 + $0xd0] sm:$0xff]  ;;  %v536_v22 = vld [vmem:[#allocation11 + $0xe0] sm:$0xff] }
  0xad   :  { %1323 = vmatprep.subr.bf16.mxu1 %v1775_v0  ;;  %v537_v17 = vld [vmem:[#allocation11 + $0xe8] sm:$0xff]  ;;  %v429_v20 = vld [vmem:[#allocation10 + $0x70] sm:$0xff]  ;;  %v998_v29 = vld [vmem:[%s2130_s4] ss:$0 sm:$0xff] }
  0xae   :  { %1298 = vmatpush3.bf16.msra.mxu0 %v1297_v46  ;;  %v512_v46 = vld [vmem:[#allocation11 + $0x20] sm:$0xff]  ;;  %v612_v26 = vld [vmem:[#allocation13 + $0x8] sm:$0xff]  ;;  %v613_v32 = vld [vmem:[#allocation13 + $0x10] sm:$0xff] }
  0xaf   :  { %1299 = vmatprep.subr.bf16.mxu0 %v1775_v0  ;;  %v1380_v51 = vpack.c.bf16 %v514_v47, %v512_v46  ;;  %v611_v31 = vld [vmem:[#allocation13] sm:$0xff]  ;;  %v616_v35 = vld [vmem:[#allocation13 + $0x28] sm:$0xff]  ;;  %v630_v55 = vld [vmem:[#allocation13 + $0x98] sm:$0xff] }
  0xb0   :  { %1325 = vmatpush3.bf16.msra.mxu1 %v1324_v45  ;;  %v1378_v45 = vpack.c.bf16 %v515_v40, %v513_v39  ;;  %v1998_v38 = vpack.c.bf16 %v613_v32, %v611_v31  ;;  %v615_v40 = vld [vmem:[#allocation13 + $0x20] sm:$0xff]  ;;  %v628_v54 = vld [vmem:[#allocation13 + $0x88] sm:$0xff]  ;;  %v634_v61 = vld [vmem:[#allocation13 + $0xb8] sm:$0xff] }
  0xb1   :  { %1350 = vmatprep.subr.bf16.mxu1 %v1775_v0  ;;  %v619_v47 = vld [vmem:[#allocation13 + $0x40] sm:$0xff]  ;;  %v632_v60 = vld [vmem:[#allocation13 + $0xa8] sm:$0xff]  ;;  %v638_v5 = vld [vmem:[#allocation13 + $0xd8] sm:$0xff] }
  0xb2   :  { %1301 = vmatpush3.bf16.msra.mxu0 %v1300_v50  ;;  %v519_v50 = vld [vmem:[#allocation11 + $0x58] sm:$0xff]  ;;  %v636_v4 = vld [vmem:[#allocation13 + $0xc8] sm:$0xff]  ;;  %v724_v32 = vld [vmem:[#allocation14 + $0x20] sm:$0xff] }
  0xb3   :  { %1206 = vmatmul.mubr.f32.vlgmr.msra.gmra.mrb[0].mxu1 %v143_v49  ;;  %1326 = vmatprep.subr.bf16.mxu0 %v1775_v0  ;;  %v640_v10 = vld [vmem:[#allocation13 + $0xe8] sm:$0xff]  ;;  %v642_v11 = vld [vmem:[#allocation13 + $0xf8] sm:$0xff] }
  0xb4   :  { %1275 = vmatprep.mubr.msk.f32.mxu1 %vm1776_vm0, %v1777_v1  ;;  %1352 = vmatpush3.bf16.msra.mxu1 %v1351_v18  ;;  %v539_v18 = vld [vmem:[#allocation11 + $0xf8] sm:$0xff] }
  0xb5   :  { %1171 = vmatmul.mubr.f32.vlgmr.msra.gmra.mrb[0].mxu0 %v143_v49  ;;  %1353 = vmatprep.subr.bf16.mxu1 %v1775_v0  ;;  %v517_v49 = vld [vmem:[#allocation11 + $0x48] sm:$0xff]  ;;  %v1402_v19 = vpack.c.bf16 %v539_v18, %v537_v17  ;;  %v736_v17 = vld [vmem:[#allocation14 + $0x80] sm:$0xff] }
  0xb6   :  { %1328 = vmatpush3.bf16.msra.mxu0 %v1327_v53  ;;  %1240 = vmatprep.mubr.msk.f32.mxu0 %vm1776_vm0, %v1777_v1  ;;  %v518_v53 = vld [vmem:[#allocation11 + $0x50] sm:$0xff]  ;;  %v737_v18 = vld [vmem:[#allocation14 + $0x88] sm:$0xff] }
  0xb7   :  { %1329 = vmatprep.subr.bf16.mxu0 %v1775_v0 }
  0xb8   :  { %1355 = vmatpush3.bf16.msra.mxu1 %v1354_v21  ;;  %v430_v21 = vld [vmem:[#allocation10 + $0x78] sm:$0xff] }
  0xb9   :  { %1356 = vmatprep.subr.bf16.mxu1 %v1775_v0  ;;  %v1372_v23 = vpack.c.bf16 %v430_v21, %v429_v20  ;;  %v2045_v20 = vpack.c.bf16 %v737_v18, %v736_v17  ;;  %v721_v21 = vld [vmem:[#allocation14 + $0x8] sm:$0xff]  ;;  %v999_v17 = vld [vmem:[%s2135_s9] ss:$0 sm:$0xff]  ;;  %s1729_s9 = scalar_lea.vmem %s983_s12, 256 }
  0xba   :  { %1331 = vmatpush3.bf16.msra.mxu0 %v1330_v56  ;;  %v1384_v56 = vpack.c.bf16 %v518_v53, %v516_v52  ;;  %v623_v52 = vld [vmem:[#allocation13 + $0x60] sm:$0xff]  ;;  %v625_v53 = vld [vmem:[#allocation13 + $0x70] sm:$0xff]  ;;  %p1730_p8 = scmp.ne.s32.totalorder %s983_s12, %s1729_s9  ;;  %p1735_p10 = scmp.lt.s32.totalorder %s1729_s9, %s1729_s9 }
  0xbb   :  { %1332 = vmatprep.subr.bf16.mxu0 %v1775_v0 }
  0xbc   :  { %1358 = vmatpush3.bf16.msra.mxu1 %v1357_v24  ;;  %v538_v24 = vld [vmem:[#allocation11 + $0xf0] sm:$0xff]  ;;  %p1736_p11 = por %p1735_p10, %p1734_p9 }
  0xbd   :  { %1359 = vmatprep.subr.bf16.mxu1 %v1775_v0  ;;  %v1404_v25 = vpack.c.bf16 %v538_v24, %v536_v22  ;;  %v738_v22 = vld [vmem:[#allocation14 + $0x90] sm:$0xff] }
  0xbe   :  { %1334 = vmatpush3.bf16.msra.mxu0 %v1333_v59  ;;  %v522_v59 = vld [vmem:[#allocation11 + $0x70] sm:$0xff]  ;;  %p1737_p12 = pnand %p1736_p11, %p1730_p8 }
  0xbf   :  { %1335 = vmatprep.subr.bf16.mxu0 %v1775_v0 }
  0xc0   :  { %1361 = vmatpush3.bf16.msra.mxu1 %v1360_v27  ;;  %v614_v27 = vld [vmem:[#allocation13 + $0x18] sm:$0xff] }
  0xc1   :  { %1362 = vmatprep.subr.bf16.mxu1 %v1775_v0  ;;  %v1992_v28 = vpack.c.bf16 %v614_v27, %v612_v26  ;;  %v722_v26 = vld [vmem:[#allocation14 + $0x10] sm:$0xff]  ;;  %v723_v27 = vld [vmem:[#allocation14 + $0x18] sm:$0xff] }
  0xc2   :  { %1337 = vmatpush3.bf16.msra.mxu0 %v1336_v62  ;;  %v1388_v62 = vpack.c.bf16 %v522_v59, %v520_v58  ;;  %v627_v58 = vld [vmem:[#allocation13 + $0x80] sm:$0xff]  ;;  %v629_v59 = vld [vmem:[#allocation13 + $0x90] sm:$0xff] }
  0xc3   :  { %1338 = vmatprep.subr.bf16.mxu0 %v1775_v0 }
  0xc4   :  { %1364 = vmatpush3.bf16.msra.mxu1 %v1363_v30 }
  0xc5   :  { %1365 = vmatprep.subr.bf16.mxu1 %v1775_v0 }
  0xc6   :  { %1340 = vmatpush3.bf16.msra.mxu0 %v1339_v3  ;;  %v526_v3 = vld [vmem:[#allocation11 + $0x90] sm:$0xff] }
  0xc7   :  { %1341 = vmatprep.subr.bf16.mxu0 %v1775_v0 }
  0xc8   :  { %1367 = vmatpush3.bf16.msra.mxu1 %v1366_v33 }
  0xc9   :  { %1368 = vmatprep.subr.bf16.mxu1 %v1775_v0 }
  0xca   :  { %1343 = vmatpush3.bf16.msra.mxu0 %v1342_v6  ;;  %v1392_v6 = vpack.c.bf16 %v526_v3, %v524_v2  ;;  %v631_v2 = vld [vmem:[#allocation13 + $0xa0] sm:$0xff]  ;;  %v633_v3 = vld [vmem:[#allocation13 + $0xb0] sm:$0xff] }
  0xcb   :  { %1344 = vmatprep.subr.bf16.mxu0 %v1775_v0 }
  0xcc   :  { %1370 = vmatpush3.bf16.msra.mxu1 %v1369_v36  ;;  %v618_v36 = vld [vmem:[#allocation13 + $0x38] sm:$0xff] }
  0xcd   :  { %1371 = vmatprep.subr.bf16.mxu1 %v1775_v0  ;;  %v2000_v39 = vpack.c.bf16 %v618_v36, %v616_v35  ;;  %v743_v35 = vld [vmem:[#allocation14 + $0xb8] sm:$0xff] }
  0xce   :  { %1346 = vmatpush3.bf16.msra.mxu0 %v1345_v9  ;;  %v530_v9 = vld [vmem:[#allocation11 + $0xb0] sm:$0xff] }
  0xcf   :  { %1347 = vmatprep.subr.bf16.mxu0 %v1775_v0  ;;  %v1382_v0 = vpack.c.bf16 %v519_v50, %v517_v49  ;;  %v624_v49 = vld [vmem:[#allocation13 + $0x68] sm:$0xff]  ;;  %v626_v50 = vld [vmem:[#allocation13 + $0x78] sm:$0xff] }
  0xd0   :  { %1373 = vmatpush3.bf16.msra.mxu1 %v1372_v23  ;;  %v739_v23 = vld [vmem:[#allocation14 + $0x98] sm:$0xff] }
  0xd1   :  { %1407 = vmatprep.subr.bf16.mxu1 %v1992_v28 }
  0xd2   :  { %1349 = vmatpush3.bf16.msra.mxu0 %v1348_v12  ;;  %v1396_v12 = vpack.c.bf16 %v530_v9, %v528_v8  ;;  %v635_v8 = vld [vmem:[#allocation13 + $0xc0] sm:$0xff]  ;;  %v637_v9 = vld [vmem:[#allocation13 + $0xd0] sm:$0xff] }
  0xd3   :  { %1375 = vmatprep.subr.bf16.mxu0 %v1374_v16  ;;  %v1400_v16 = vpack.c.bf16 %v534_v15, %v532_v14  ;;  %v639_v14 = vld [vmem:[#allocation13 + $0xe0] sm:$0xff]  ;;  %v641_v15 = vld [vmem:[#allocation13 + $0xf0] sm:$0xff] }
 0x186   :  { %v319_v41 = vpop.f32.mrb[0].mxu1 }
 0x187   :  { %vm323_vm1 = vcmp.gt.f32.partialorder %v319_v41, 0.0  ;;  %v324_v42 = vmul.f32 0.2, %v319_v41  ;;  %v1207_v43 = vpop.f32.mrb[1].mxu1 }
 0x188   :  { %v620_v43 = vld [vmem:[#allocation13 + $0x48] sm:$0xff] }
 0x189   :  { %v325_v48 = vsel %vm323_vm1, %v319_v41, %v324_v42  ;;  %v617_v41 = vld [vmem:[#allocation13 + $0x30] sm:$0xff] }
 0x18a   :  { %1241 = vmatmul.mubr.f32.vlgmr.msra.gmra.mrb[0].mxu0 %v325_v48  ;;  %v621_v48 = vld [vmem:[#allocation13 + $0x50] sm:$0xff] }
 0x18b   :  { %1377 = vmatpush1.bf16.msra.mxu0 %v1376_v44  ;;  %604 = vmatprep.mubr.f32.mxu0 %v1777_v1  ;;  %v622_v44 = vld [vmem:[#allocation13 + $0x58] sm:$0xff] }
 0x18c   :  { %1379 = vmatprep.subr.bf16.mxu0 %v1378_v45  ;;  %v2003_v45 = vpack.c.bf16 %v617_v41, %v615_v40  ;;  %v2007_v46 = vpack.c.bf16 %v622_v44, %v620_v43  ;;  %v726_v40 = vld [vmem:[#allocation14 + $0x30] sm:$0xff]  ;;  %v727_v41 = vld [vmem:[#allocation14 + $0x38] sm:$0xff]  ;;  %v745_v43 = vld [vmem:[#allocation14 + $0xc8] sm:$0xff] }
 0x18d   :  { %v2065_v44 = vpack.c.bf16 %v727_v41, %v726_v40 }
 0x18f   :  { %1381 = vmatpush1.bf16.msra.mxu0 %v1380_v51  ;;  %v2010_v51 = vpack.c.bf16 %v621_v48, %v619_v47  ;;  %v728_v48 = vld [vmem:[#allocation14 + $0x40] sm:$0xff] }
 0x190   :  { %1383 = vmatprep.subr.bf16.mxu0 %v1382_v0  ;;  %v2013_v0 = vpack.c.bf16 %v626_v50, %v624_v49  ;;  %v729_v49 = vld [vmem:[#allocation14 + $0x48] sm:$0xff]  ;;  %v746_v50 = vld [vmem:[#allocation14 + $0xd0] sm:$0xff] }
 0x193   :  { %1385 = vmatpush1.bf16.msra.mxu0 %v1384_v56  ;;  %v2016_v56 = vpack.c.bf16 %v625_v53, %v623_v52  ;;  %v747_v52 = vld [vmem:[#allocation14 + $0xd8] sm:$0xff]  ;;  %v2071_v53 = vpack.c.bf16 %v729_v49, %v728_v48 }
 0x194   :  { %1387 = vmatprep.subr.bf16.mxu0 %v1386_v57  ;;  %v2019_v57 = vpack.c.bf16 %v630_v55, %v628_v54  ;;  %v2074_v54 = vpack.c.bf16 %v747_v52, %v746_v50  ;;  %v730_v55 = vld [vmem:[#allocation14 + $0x50] sm:$0xff] }
 0x197   :  { %1389 = vmatpush1.bf16.msra.mxu0 %v1388_v62  ;;  %v2022_v62 = vpack.c.bf16 %v629_v59, %v627_v58  ;;  %v731_v58 = vld [vmem:[#allocation14 + $0x58] sm:$0xff]  ;;  %v748_v59 = vld [vmem:[#allocation14 + $0xe0] sm:$0xff] }
 0x198   :  { %1391 = vmatprep.subr.bf16.mxu0 %v1390_v63  ;;  %v2025_v63 = vpack.c.bf16 %v634_v61, %v632_v60  ;;  %v749_v60 = vld [vmem:[#allocation14 + $0xe8] sm:$0xff]  ;;  %v1460_v61 = vpack.c.bf16 %v731_v58, %v730_v55 }
 0x19b   :  { %1393 = vmatpush1.bf16.msra.mxu0 %v1392_v6  ;;  %v2028_v6 = vpack.c.bf16 %v633_v3, %v631_v2  ;;  %v1462_v2 = vpack.c.bf16 %v749_v60, %v748_v59  ;;  %v732_v3 = vld [vmem:[#allocation14 + $0x60] sm:$0xff] }
 0x19c   :  { %1395 = vmatprep.subr.bf16.mxu0 %v1394_v7  ;;  %v2031_v7 = vpack.c.bf16 %v638_v5, %v636_v4  ;;  %v733_v4 = vld [vmem:[#allocation14 + $0x68] sm:$0xff] }
 0x19d   :  { %v1464_v5 = vpack.c.bf16 %v733_v4, %v732_v3 }
 0x19f   :  { %1397 = vmatpush1.bf16.msra.mxu0 %v1396_v12  ;;  %v2034_v12 = vpack.c.bf16 %v637_v9, %v635_v8 }
 0x1a0   :  { %1399 = vmatprep.subr.bf16.mxu0 %v1398_v13  ;;  %v2037_v13 = vpack.c.bf16 %v642_v11, %v640_v10 }
 0x1a3   :  { %1401 = vmatpush1.bf16.msra.mxu0 %v1400_v16  ;;  %v2040_v16 = vpack.c.bf16 %v641_v15, %v639_v14 }
 0x1a4   :  { %1403 = vmatprep.subr.bf16.mxu0 %v1402_v19  ;;  %v720_v19 = vld [vmem:[#allocation14] sm:$0xff] }
 0x1a5   :  { %v2047_v24 = vpack.c.bf16 %v721_v21, %v720_v19 }
 0x1a7   :  { %1405 = vmatpush1.bf16.msra.mxu0 %v1404_v25  ;;  %v2049_v25 = vpack.c.bf16 %v739_v23, %v738_v22 }
 0x1a8   :  { %1439 = vmatprep.subr.bf16.mxu0 %v2045_v20 }
 0x25d   :  { %v408_v30 = vpop.f32.mrb[0].mxu0 }
 0x25e   :  { %v1534_v33 = vadd.f32 %v998_v29, %v408_v30  ;;  %v1242_v34 = vpop.f32.mrb[1].mxu0  ;;  %v740_v29 = vld [vmem:[#allocation14 + $0xa0] sm:$0xff]  ;;  %v741_v30 = vld [vmem:[#allocation14 + $0xa8] sm:$0xff] }
 0x25f   :  { %v2056_v31 = vpack.c.bf16 %v741_v30, %v740_v29  ;;  %v742_v34 = vld [vmem:[#allocation14 + $0xb0] sm:$0xff] }
 0x260   :  { %vm412_vm2 = vcmp.gt.f32.partialorder %v1534_v33, 0.0  ;;  %v413_v37 = vmul.f32 0.2, %v1534_v33 }
 0x262   :  { %v414_v42 = vsel %vm412_vm2, %v1534_v33, %v413_v37  ;;  %v725_v33 = vld [vmem:[#allocation14 + $0x28] sm:$0xff]  ;;  %v2062_v37 = vpack.c.bf16 %v743_v35, %v742_v34 }
 0x263   :  { %1276 = vmatmul.mubr.f32.vlgmr.msra.gmra.mrb[2].mxu1 %v414_v42  ;;  %605 = vmatmul.mubr.f32.vlgmr.msra.gmra.mrb[2].mxu0 %v414_v42  ;;  %v2059_v36 = vpack.c.bf16 %v725_v33, %v724_v32  ;;  %v744_v42 = vld [vmem:[#allocation14 + $0xc0] sm:$0xff] }
 0x264   :  { %1409 = vmatpush1.bf16.msra.mxu1 %v1998_v38  ;;  %707 = vmatprep.mubr.f32.mxu1 %v1777_v1  ;;  %v2068_v47 = vpack.c.bf16 %v745_v43, %v744_v42 }
 0x265   :  { %1411 = vmatprep.subr.bf16.mxu1 %v2000_v39  ;;  %1441 = vmatpush3.bf16.msra.mxu0 %v2047_v24 }
 0x266   :  { %1443 = vmatprep.subr.bf16.mxu0 %v2049_v25 }
 0x268   :  { %1413 = vmatpush1.bf16.msra.mxu1 %v2003_v45 }
 0x269   :  { %1415 = vmatprep.subr.bf16.mxu1 %v2007_v46 }
 0x26c   :  { %1417 = vmatpush1.bf16.msra.mxu1 %v2010_v51 }
 0x26d   :  { %1419 = vmatprep.subr.bf16.mxu1 %v2013_v0 }
 0x270   :  { %1421 = vmatpush1.bf16.msra.mxu1 %v2016_v56 }
 0x271   :  { %1423 = vmatprep.subr.bf16.mxu1 %v2019_v57 }
 0x274   :  { %1425 = vmatpush1.bf16.msra.mxu1 %v2022_v62 }
 0x275   :  { %1427 = vmatprep.subr.bf16.mxu1 %v2025_v63 }
 0x278   :  { %1429 = vmatpush1.bf16.msra.mxu1 %v2028_v6 }
 0x279   :  { %1431 = vmatprep.subr.bf16.mxu1 %v2031_v7 }
 0x27c   :  { %1433 = vmatpush1.bf16.msra.mxu1 %v2034_v12 }
 0x27d   :  { %1435 = vmatprep.subr.bf16.mxu1 %v2037_v13 }
 0x280   :  { %1437 = vmatpush1.bf16.msra.mxu1 %v2040_v16 }
 0x281   :  { %1471 = vmatprep.subr.bf16.mxu1 %v1992_v28  ;;  %v2053_v28 = vpack.c.bf16 %v723_v27, %v722_v26 }
 0x283   :  { %1445 = vmatpush3.bf16.msra.mxu0 %v2053_v28 }
 0x284   :  { %1447 = vmatprep.subr.bf16.mxu0 %v2056_v31 }
 0x287   :  { %1449 = vmatpush3.bf16.msra.mxu0 %v2059_v36 }
 0x288   :  { %1451 = vmatprep.subr.bf16.mxu0 %v2062_v37 }
 0x28b   :  { %1453 = vmatpush3.bf16.msra.mxu0 %v2065_v44 }
 0x28c   :  { %1455 = vmatprep.subr.bf16.mxu0 %v2068_v47 }
 0x28f   :  { %1457 = vmatpush3.bf16.msra.mxu0 %v2071_v53 }
 0x290   :  { %1459 = vmatprep.subr.bf16.mxu0 %v2074_v54 }
 0x293   :  { %1461 = vmatpush3.bf16.msra.mxu0 %v1460_v61 }
 0x294   :  { %1463 = vmatprep.subr.bf16.mxu0 %v1462_v2 }
 0x297   :  { %1465 = vmatpush3.bf16.msra.mxu0 %v1464_v5 }
 0x336   :  { %v2078_v8 = vpop.f32.mrb[2].mxu1  ;;  %v606_v9 = vpop.f32.mrb[2].mxu0 }
 0x337   :  { %v1277_v10 = vpop.f32.mrb[3].mxu1  ;;  %v608_v11 = vpop.f32.mrb[3].mxu0  ;;  %708 = vmatmul.mubr.f32.vlgmr.msra.gmra.mrb[4].mxu1 %v606_v9 }
 0x338   :  { %1473 = vmatpush1.bf16.msra.mxu1 %v1998_v38  ;;  %886 = vmatprep.mubr.f32.mxu1 %v1777_v1  ;;  %v750_v1 = vld [vmem:[#allocation14 + $0xf0] sm:$0xff]  ;;  %v751_v38 = vld [vmem:[#allocation14 + $0xf8] sm:$0xff] }
 0x339   :  { %1475 = vmatprep.subr.bf16.mxu1 %v2000_v39  ;;  %v1466_v39 = vpack.c.bf16 %v751_v38, %v750_v1 }
 0x33b   :  { %1467 = vmatprep.subr.bf16.mxu0 %v1466_v39 }
 0x33c   :  { %1477 = vmatpush1.bf16.msra.mxu1 %v2003_v45  ;;  %v734_v45 = vld [vmem:[#allocation14 + $0x70] sm:$0xff] }
 0x33d   :  { %1479 = vmatprep.subr.bf16.mxu1 %v2007_v46  ;;  %v735_v46 = vld [vmem:[#allocation14 + $0x78] sm:$0xff] }
 0x340   :  { %1481 = vmatpush1.bf16.msra.mxu1 %v2010_v51  ;;  %v1468_v51 = vpack.c.bf16 %v735_v46, %v734_v45 }
 0x341   :  { %1483 = vmatprep.subr.bf16.mxu1 %v2013_v0 }
 0x342   :  { %1469 = vmatpush3.bf16.msra.mxu0 %v1468_v51 }
 0x343   :  { %1503 = vmatprep.subr.bf16.mxu0 %v2045_v20  ;;  %v505_v20 = vadd.f32 %v999_v17, %v2078_v8 }
 0x344   :  { %1485 = vmatpush1.bf16.msra.mxu1 %v2016_v56 }
 0x345   :  { %1487 = vmatprep.subr.bf16.mxu1 %v2019_v57 }
 0x348   :  { %1489 = vmatpush1.bf16.msra.mxu1 %v2022_v62 }
 0x349   :  { %1491 = vmatprep.subr.bf16.mxu1 %v2025_v63 }
 0x34c   :  { %1493 = vmatpush1.bf16.msra.mxu1 %v2028_v6 }
 0x34d   :  { %1495 = vmatprep.subr.bf16.mxu1 %v2031_v7 }
 0x350   :  { %1497 = vmatpush1.bf16.msra.mxu1 %v2034_v12 }
 0x351   :  { %1499 = vmatprep.subr.bf16.mxu1 %v2037_v13 }
 0x354   :  { %1501 = vmatpush1.bf16.msra.mxu1 %v2040_v16 }
 0x357   :  { %887 = vmatmul.mubr.f32.vlgmr.msra.gmra.mrb[6].mxu1 %v608_v11 }
 0x40a   :  { %v709_v0 = vpop.f32.mrb[4].mxu1 }
 0x40b   :  { %v716_v56 = vmul.f32 0.2, %v709_v0  ;;  %v711_v57 = vpop.f32.mrb[5].mxu1  ;;  %vm714_vm3 = vcmp.gt.f32.partialorder %v709_v0, 0.0 }
 0x40c   :  { %vm715_vm4 = vcmp.gt.f32.partialorder %v711_v57, 0.0  ;;  %v717_v62 = vmul.f32 0.2, %v711_v57 }
 0x40d   :  { %v718_v6 = vsel %vm714_vm3, %v709_v0, %v716_v56 }
 0x40e   :  { %v719_v63 = vsel %vm715_vm4, %v711_v57, %v717_v62 }
 0x40f   :  { %816 = vmatprep.mubr.f32.mxu0 %v719_v63 }
 0x410   :  { %817 = vmatmul.mubr.f32.vlgmr.msra.gmra.mrb[4].mxu0 %v718_v6 }
 0x411   :  { %1505 = vmatpush3.bf16.msra.mxu0 %v2047_v24 }
 0x412   :  { %1507 = vmatprep.subr.bf16.mxu0 %v2049_v25 }
 0x415   :  { %1509 = vmatpush3.bf16.msra.mxu0 %v2053_v28 }
 0x416   :  { %1511 = vmatprep.subr.bf16.mxu0 %v2056_v31 }
 0x419   :  { %1513 = vmatpush3.bf16.msra.mxu0 %v2059_v36 }
 0x41a   :  { %1515 = vmatprep.subr.bf16.mxu0 %v2062_v37 }
 0x41d   :  { %1517 = vmatpush3.bf16.msra.mxu0 %v2065_v44 }
 0x41e   :  { %1519 = vmatprep.subr.bf16.mxu0 %v2068_v47 }
 0x421   :  { %1521 = vmatpush3.bf16.msra.mxu0 %v2071_v53 }
 0x422   :  { %1523 = vmatprep.subr.bf16.mxu0 %v2074_v54 }
 0x425   :  { %1525 = vmatpush3.bf16.msra.mxu0 %v1460_v61 }
 0x426   :  { %1527 = vmatprep.subr.bf16.mxu0 %v1462_v2 }
 0x429   :  { %1529 = vmatpush3.bf16.msra.mxu0 %v1464_v5 }
 0x42a   :  { %v888_v7 = vpop.f32.mrb[6].mxu1  ;;  %1531 = vmatprep.subr.bf16.mxu0 %v1466_v39 }
 0x42b   :  { %v895_v12 = vmul.f32 0.2, %v888_v7  ;;  %v890_v13 = vpop.f32.mrb[7].mxu1  ;;  %vm893_vm5 = vcmp.gt.f32.partialorder %v888_v7, 0.0 }
 0x42c   :  { %vm894_vm6 = vcmp.gt.f32.partialorder %v890_v13, 0.0  ;;  %v896_v14 = vmul.f32 0.2, %v890_v13 }
 0x42d   :  { %1533 = vmatpush3.bf16.msra.mxu0 %v1468_v51  ;;  %v897_v16 = vsel %vm893_vm5, %v888_v7, %v895_v12 }
 0x42e   :  { %v898_v15 = vsel %vm894_vm6, %v890_v13, %v896_v14 }
 0x42f   :  { %963 = vmatprep.mubr.f32.mxu0 %v898_v15 }
 0x430   :  { %964 = vmatmul.mubr.f32.vlgmr.msra.gmra.mrb[6].mxu0 %v897_v16 }
 0x4e3   :  { %v1100_v18 = vpop.f32.mrb[4].mxu0 }
 0x4e4   :  { %v1101_v19 = vpop.f32.mrb[5].mxu0 }
 0x4e5   :  { %v1102_v21 = vadd.f32 %v1101_v19, %v1100_v18 }
 0x4e7   :  { %v819_v22 = vadd.f32 %v1102_v21, %v505_v20 }
 0x4e9   :  { %v971_v23 = vmul.f32 0.2, %v819_v22  ;;  %vm969_vm7 = vcmp.gt.f32.partialorder %v819_v22, 0.0 }
 0x4eb   :  { %v973_v24 = vsel %vm969_vm7, %v819_v22, %v971_v23 }
 0x4ec   :  { %975 = vst [vmem:[#allocation16] sm:$0xff] %v973_v24 }
 0x503   :  { %v1135_v25 = vpop.f32.mrb[6].mxu0 }
 0x504   :  { %v1136_v26 = vpop.f32.mrb[7].mxu0 }
 0x505   :  { %v1137_v27 = vadd.f32 %v1136_v26, %v1135_v25 }
 0x507   :  { %v966_v29 = vadd.f32 %v1137_v27, %v505_v20 }
 0x509   :  { %v972_v30 = vmul.f32 0.2, %v966_v29  ;;  %vm970_vm8 = vcmp.gt.f32.partialorder %v966_v29, 0.0 }
 0x50b   :  { %v974_v28 = vsel %vm970_vm8, %v966_v29, %v972_v30 }
 0x50c   :  { %976 = vst [vmem:[#allocation16 + $0x8] sm:$0xff] %v974_v28 }
 0x50d   :  { %1740 = shalt.err (!%p1737_p12)
}
 0x50e   :  { %s1741_s17 = scalar_lea.hbm %s2136_s10, 256 }
 0x50f   :  { %p1742_p13 = scmp.ne.s32.totalorder %s2136_s10, %s1741_s17  ;;  %p1745_p0 = scmp.lt.u32.totalorder %s1741_s17, %s2136_s10 }
 0x511   :  { %p1747_p1 = pnand %p1745_p0, %p1742_p13 }
 0x513   :  { %1750 = shalt.err (!%p1747_p1)
}
 0x514   :  { %988 = dma.vmem_to_hbm [thread:$0]  %s983_s12, 256, %s2136_s10, [#allocation4], %s1764_s23, %s1764_s23, %s1765_s24  }
 0x515   :  { %1761 = dma.done.wait [#allocation4], 256  }
 0x516   :  { %1762 = vsyncadd [#allocation4], 4294967040 }
 0x517   :  { %992 = vsyncpa [#allocation3], 1 }
 0x518   :  { %993 = vsyncpa [#allocation6], 1 }
 0x519   :  { %994 = vsyncpa [#allocation9], 1 }
 0x51a   :  { %995 = vsyncpa [#allocation12], 1 }
 0x51b   :  { %996 = vsyncpa [#allocation15], 1 }
 0x51c   :  { %997 = vsyncpa [#allocation4], 1 }

</bundles_post_ra>
